<compile_context>
chip_gen: v7x
topology: tpu7x:2x2x1
jax: 0.10.0
libtpu: 0.0.40
codegen_flags: <defaults>
</compile_context>

<pallas_src>
import jax
import jax.numpy as jnp
from jax.experimental import pallas as pl
from jax.experimental.pallas import tpu as pltpu


def _swish_kernel(x_ref, o_ref):
    xf = x_ref[...].astype(jnp.float32)
    # sigmoid(x) = 0.5 * (tanh(x/2) + 1)  -- exact, EUP-friendly.
    sig = 0.5 * (jnp.tanh(0.5 * xf) + 1.0)
    o_ref[...] = (xf * sig).astype(o_ref.dtype)


_LANE_CANDIDATES = (2048, 1024, 512, 256, 128)
# Below this, pallas_call launch + wrapper reshapes dominate; XLA's fused
# elementwise already sits at roofline for tiny activations.
_SMALL_INPUT_BYTES = 512 * 1024


def _chip_config():
    """Returns (target_tile_bytes, multi_tensorcore) for the local TPU."""
    target_tile_bytes = 2 * 1024 * 1024   # v5e/v6e sweet spot (~85% roofline)
    multi_tc = False
    try:
        kind = jax.devices()[0].device_kind.lower()
    except Exception:
        kind = ""
    if "v7" in kind or "7x" in kind:
        # v7x: ~3.2 TB/s HBM and 2 TensorCores/chip -> bigger tiles and a
        # balanced, even grid so both cores stay at the HBM roofline.
        target_tile_bytes = 4 * 1024 * 1024
        multi_tc = True
    return target_tile_bytes, multi_tc


def _round_up(a, m):
    return ((a + m - 1) // m) * m


def swish(x: jax.Array, *, use_pallas=None) -> jax.Array:
    """Elementwise Swish matching PyTorch's `x * F.sigmoid(x)` semantics.

    Note: PyTorch's `inplace=True` mutates the input tensor; JAX arrays are
    immutable, so we return a new array with identical values.
    """
    orig_shape = x.shape
    orig_dtype = x.dtype
    n = x.size
    itemsize = jnp.dtype(orig_dtype).itemsize

    if n == 0:
        return x

    if use_pallas is None:
        use_pallas = n * itemsize >= _SMALL_INPUT_BYTES
    if not use_pallas:
        # Tiny-input fast path.
        return x * jax.nn.sigmoid(x)

    target_tile_bytes, multi_tc = _chip_config()

    flat = x.reshape(-1)  # contiguous reshape: free, no HBM copy

    # --- lane width: widest candidate dividing n that leaves >= 8 rows;
    # fall back to any divisor, then to 128 with padding (swish(0)==0, the
    # padded tail is sliced away below). ---
    lanes = None
    for cand in _LANE_CANDIDATES:
        if n % cand == 0 and (n // cand) >= 8:
            lanes = cand
            break
    if lanes is None:
        for cand in _LANE_CANDIDATES:
            if n % cand == 0:
                lanes = cand
                break
    pad = 0
    if lanes is None:
        lanes = 128
        pad = (-n) % lanes
        flat = jnp.pad(flat, (0, pad))

    n_rows = flat.size // lanes
    x2d = flat.reshape(n_rows, lanes)

    # dtype-aware sublane multiple: f32 -> 8, bf16/f16 -> 16, int8/fp8 -> 32.
    sub = max(8, 32 // itemsize)

    # --- row tile selection ---
    rows_per_tile = max(1, target_tile_bytes // (lanes * itemsize))
    if n_rows <= sub:
        tile_r = n_rows  # full extent: always a legal block shape
    else:
        tile_r = min(n_rows, rows_per_tile)
        tile_r = max(sub, (tile_r // sub) * sub)
        if multi_tc:
            n_tiles = pl.cdiv(n_rows, tile_r)
            if n_tiles == 1 and n_rows >= 2 * sub:
                # Split into exactly 2 balanced steps for the 2 TensorCores
                # (round UP so we never end up with 3 unbalanced steps).
                tile_r = _round_up(pl.cdiv(n_rows, 2), sub)
            elif n_tiles > 1 and n_tiles % 2 == 1:
                # Nudge to an even step count so neither core idles on the tail.
                tile_r = max(sub, _round_up(pl.cdiv(n_rows, n_tiles + 1), sub))
    n_tiles = pl.cdiv(n_rows, tile_r)
    # A ragged last row-tile is handled by Pallas masked boundary blocks
    # (OOB reads unspecified, OOB writes dropped) -- safe for elementwise ops.

    out2d = pl.pallas_call(
        _swish_kernel,
        out_shape=jax.ShapeDtypeStruct((n_rows, lanes), orig_dtype),
        grid_spec=pltpu.PrefetchScalarGridSpec(
            num_scalar_prefetch=0,
            grid=(n_tiles,),
            in_specs=[pl.BlockSpec((tile_r, lanes), lambda i: (i, 0))],
            out_specs=pl.BlockSpec((tile_r, lanes), lambda i: (i, 0)),
        ),
        compiler_params=pltpu.CompilerParams(
            dimension_semantics=("parallel",),
            # Worst case: 4 MiB tile x 2 buffers x (in + out) = 16 MiB; 32 MiB
            # gives headroom and fits every generation's physical VMEM
            # (including v7x's 64 MiB).
            vmem_limit_bytes=32 * 1024 * 1024,
        ),
        cost_estimate=pl.CostEstimate(
            flops=4 * n,
            transcendentals=n,
            bytes_accessed=2 * n * itemsize,
        ),
    )(x2d)

    out_flat = out2d.reshape(-1)
    if pad:
        out_flat = out_flat[:n]
    return out_flat.reshape(orig_shape)


if __name__ == "__main__":
    key = jax.random.PRNGKey(0)
    k1, k2 = jax.random.split(key)

    # NCHW, matching the PyTorch conv-style layout this module is used in.
    x_small = jax.random.normal(k1, (2, 4, 16, 16), dtype=jnp.float32)
    # Larger activation that exercises the tiled Pallas path.
    x_big = jax.random.normal(k2, (8, 64, 32, 32), dtype=jnp.float32)

    y_small_auto = swish(x_small)                     # tiny-input fast path
    y_small_pallas = swish(x_small, use_pallas=True)  # force the Pallas kernel
    y_big = swish(x_big)                              # tiled Pallas path
    jax.block_until_ready((y_small_auto, y_small_pallas, y_big))

    for y, xin in ((y_small_auto, x_small),
                   (y_small_pallas, x_small),
                   (y_big, x_big)):
        y_ref = xin * jax.nn.sigmoid(xin)
        assert y.shape == xin.shape and y.dtype == xin.dtype
        assert jnp.allclose(y, y_ref, atol=1e-5, rtol=1e-5)

    print("KERNEL_OK")
</pallas_src>

<mosaic_0001>
module attributes {stable_mosaic.version = 11 : i64} {
  func.func @_swish_kernel(%arg0: i32, %arg1: memref<8x256xf32, #tpu.memory_space<vmem>>, %arg2: memref<8x256xf32, #tpu.memory_space<vmem>>) attributes {dimension_semantics = [#tpu.dimension_semantics<parallel>], iteration_bounds = array<i64: 1>, scalar_prefetch = 0 : i64, scratch_operands = 0 : i64, tpu.core_type = #tpu.core_type<tc>, window_params = [{transform_indices = @transform_0, window_bounds = array<i64: 8, 256>}, {transform_indices = @transform_1, window_bounds = array<i64: 8, 256>}]} {
    %c0 = arith.constant 0 : index
    %c0_0 = arith.constant 0 : index
    %0 = vector.load %arg1[%c0, %c0_0] : memref<8x256xf32, #tpu.memory_space<vmem>>, vector<8x256xf32>
    %cst = arith.constant 5.000000e-01 : f32
    %1 = vector.broadcast %cst : f32 to vector<8x256xf32>
    %2 = arith.mulf %1, %0 : vector<8x256xf32>
    %3 = math.tanh %2 : vector<8x256xf32>
    %cst_1 = arith.constant 1.000000e+00 : f32
    %4 = vector.broadcast %cst_1 : f32 to vector<8x256xf32>
    %5 = arith.addf %3, %4 : vector<8x256xf32>
    %cst_2 = arith.constant 5.000000e-01 : f32
    %6 = vector.broadcast %cst_2 : f32 to vector<8x256xf32>
    %7 = arith.mulf %6, %5 : vector<8x256xf32>
    %8 = arith.mulf %0, %7 : vector<8x256xf32>
    %c0_3 = arith.constant 0 : index
    %c0_4 = arith.constant 0 : index
    %9 = vector.load %arg2[%c0_3, %c0_4] : memref<8x256xf32, #tpu.memory_space<vmem>>, vector<8x256xf32>
    tpu.vector_store %arg2[%c0_3, %c0_4], %8 {strides = array<i32>} : memref<8x256xf32, #tpu.memory_space<vmem>>, vector<8x256xf32>,
    return
  }
  func.func @transform_0(%arg0: i32) -> (i32, i32) {
    %c0_i32 = arith.constant 0 : i32
    %c0_i32_0 = arith.constant 0 : i32
    return %arg0, %c0_i32 : i32, i32
  }
  func.func @transform_1(%arg0: i32) -> (i32, i32) {
    %c0_i32 = arith.constant 0 : i32
    %c0_i32_0 = arith.constant 0 : i32
    return %arg0, %c0_i32 : i32, i32
  }
}

</mosaic_0001>

<bundles_post_ra>
// kernel: tpu_custom_call.1
= control target key start
LH: loop header
LB: loop body
LE: loop exit
PB: predicated region body
PF: predicated region fallthrough
CT: control target
= control target key end

     0   :  { %6 = vsyncpa [#allocation3], 0  ;;  %s140_s0 = inlined_call_operand.hbm [shape: f32[8,256], index: 0, kind: input, shape index: {}]   ;;  %s141_s1 = inlined_call_operand.hbm [shape: f32[8,256], index: 1, kind: output, shape index: {}]  }
   0x1   :  { %7 = vsyncpa [#allocation4], 0  ;;  %s104_s6 = smov [#allocation2]   ;;  %s56_s10 = scalar_lea.hbm %s140_s0, 256 }
   0x2   :  { %s14_s7 = sshll.u32 %s104_s6, 4  ;;  %p57_p0 = scmp.ne.s32.totalorder %s140_s0, %s56_s10  ;;  %s15_s7 = int_to_ptr.vmem [resolvable:$true] %s14_s7 }
   0x3   :  { %p60_p1 = scmp.lt.u32.totalorder %s56_s10, %s140_s0 }
   0x5   :  { %p62_p2 = pnand %p60_p1, %p57_p0 }
   0x7   :  { %65 = shalt.err (!%p62_p2)
}
   0x8   :  { %s66_s15 = scalar_lea.vmem %s15_s7, 256  ;;  %p71_p4 = scmp.lt.s32.totalorder %s15_s7, %s15_s7 }
   0x9   :  { %p67_p3 = scmp.ne.s32.totalorder %s15_s7, %s66_s15  ;;  %p72_p5 = scmp.lt.s32.totalorder %s66_s15, %s66_s15 }
   0xb   :  { %p73_p6 = por %p72_p5, %p71_p4 }
   0xd   :  { %p74_p7 = pnand %p73_p6, %p67_p3 }
   0xf   :  { %77 = shalt.err (!%p74_p7)
}
  0x10   :  { %17 = dma.hbm_to_vmem [thread:$0]  %s140_s0, 256, %s15_s7, [#allocation3]  }
  0x11   :  { %100 = dma.done.wait [#allocation3], 256  }
  0x12   :  { %101 = vsyncadd [#allocation3], 4294967040  ;;  %v21_v0 = vld [vmem:[#allocation2] sm:$0xff]  ;;  %v22_v1 = vld [vmem:[#allocation2 + $0x8] sm:$0xff]  ;;  %s105_s18 = smov [#allocation5]  }
  0x13   :  { %v23_v2 = vmul.f32 0.5, %v21_v0  ;;  %v24_v3 = vmul.f32 0.5, %v22_v1  ;;  %s41_s19 = sshll.u32 %s105_s18, 4  ;;  %s42_s19 = int_to_ptr.vmem [resolvable:$true] %s41_s19 }
  0x14   :  { %s78_s0 = scalar_lea.vmem %s42_s19, 256  ;;  %p83_p9 = scmp.lt.s32.totalorder %s42_s19, %s42_s19 }
  0x15   :  { %52 = vtanh.f32 %v23_v2  ;;  %p79_p8 = scmp.ne.s32.totalorder %s42_s19, %s78_s0  ;;  %p84_p10 = scmp.lt.s32.totalorder %s78_s0, %s78_s0 }
  0x16   :  { %54 = vtanh.f32 %v24_v3 }
  0x17   :  { %p85_p11 = por %p84_p10, %p83_p9 }
  0x19   :  { %p86_p12 = pnand %p85_p11, %p79_p8 }
  0x1f   :  { %v53_v4 = vpop.eup %52 }
  0x20   :  { %v55_v5 = vpop.eup %54  ;;  %v27_v6 = vadd.f32 1.0, %v53_v4 }
  0x21   :  { %v28_v7 = vadd.f32 1.0, %v55_v5 }
  0x22   :  { %v29_v8 = vmul.f32 0.5, %v27_v6 }
  0x23   :  { %v30_v9 = vmul.f32 0.5, %v28_v7 }
  0x24   :  { %v31_v10 = vmul.f32 %v29_v8, %v21_v0 }
  0x25   :  { %v32_v11 = vmul.f32 %v30_v9, %v22_v1 }
  0x26   :  { %33 = vst [vmem:[#allocation5] sm:$0xff] %v31_v10 }
  0x27   :  { %34 = vst [vmem:[#allocation5 + $0x8] sm:$0xff] %v32_v11 }
  0x28   :  { %89 = shalt.err (!%p86_p12)
}
  0x29   :  { %s90_s22 = scalar_lea.hbm %s141_s1, 256 }
  0x2a   :  { %p91_p13 = scmp.ne.s32.totalorder %s141_s1, %s90_s22  ;;  %p94_p0 = scmp.lt.u32.totalorder %s90_s22, %s141_s1 }
  0x2c   :  { %p96_p1 = pnand %p94_p0, %p91_p13 }
  0x2e   :  { %99 = shalt.err (!%p96_p1)
}
  0x2f   :  { %44 = dma.vmem_to_hbm [thread:$0]  %s42_s19, 256, %s141_s1, [#allocation4]  }
  0x30   :  { %102 = dma.done.wait [#allocation4], 256  }
  0x31   :  { %103 = vsyncadd [#allocation4], 4294967040 }
  0x32   :  { %48 = vsyncpa [#allocation3], 1 }
  0x33   :  { %49 = vsyncpa [#allocation4], 1 }

</bundles_post_ra>
